<compile_context>
chip_gen: v5e
topology: v5e:2x2
jax: 0.10.0
libtpu: 0.0.40
codegen_flags: <defaults>
</compile_context>

<pallas_src>
import jax
import jax.numpy as jnp
from jax import lax
from jax.experimental import pallas as pl
from jax.experimental.pallas import tpu as pltpu

# Small, self-consistent hyperparameters (original: embed_size=400, kernel_size=(5,400);
# vocab_size / NUMCODES are placeholder globals in the source).
VOCAB = 50
EMBED = 8              # embed_size E (conv in_channels == E, conv kernel width == E)
KH = 5                 # kernel_size[0]
OUT_CH = 2 * EMBED     # conv out_channels = 2 * embed_size = 16
NUMCODES = 10
B = 2
H = 16                 # sequence / spatial height fed to the conv
H_OUT = H - KH + 1     # 12 valid conv output rows per batch
CW = EMBED * EMBED     # 64: flattened (in_channel, kernel_width) per conv tap
BH = B * H             # 32 activation rows
BH_PAD = 40            # 32 + (KH-1)=36, rounded up to a sublane multiple
OC_PAD = 128           # 16  -> 128 lanes
NC_PAD = 128           # 10  -> 128 lanes
NEG = -1e30            # bias on padded code columns (kills them in softmax)


def _icd9_kernel(x_ref, wc_ref, bc_ref, wf_ref, bf_ref, out_ref):
    # x_ref : (BH_PAD, CW)      bf16 activation rows; row b*H+h = flattened x[b, :, h, :]
    # wc_ref: (KH, CW, OC_PAD)  bf16 per-tap conv weights (zero-padded out channels)
    # bc_ref: (1, OC_PAD)       f32 conv bias (zero-padded)
    # wf_ref: (OC_PAD, NC_PAD)  bf16 fc weight (zero-padded)
    # bf_ref: (1, NC_PAD)       f32 fc bias, padded code columns = -1e30
    # out_ref: (B, NC_PAD)      f32 softmax probabilities (padded columns == 0)

    x = x_ref[...]                                                   # load once

    # VALID conv as KH shifted, accumulating MXU matmuls (bf16 in, f32 acc).
    acc = jnp.dot(x[0:BH, :], wc_ref[0], preferred_element_type=jnp.float32)
    for dh in range(1, KH):
        acc += jnp.dot(x[dh:dh + BH, :], wc_ref[dh],
                       preferred_element_type=jnp.float32)
    acc = jnp.maximum(acc + bc_ref[...], 0.0)                        # bias + ReLU (f32)

    # Global max pool per batch: layout-preserving reshape (H=16 is a multiple of 8)
    # + one fused reduce.  Rows h >= H_OUT read past the batch in the shifted taps,
    # so mask them to 0 (safe: post-ReLU the valid max is always >= 0).
    acc3 = acc.reshape(B, H, OC_PAD)
    valid = lax.broadcasted_iota(jnp.int32, (B, H, OC_PAD), 1) < H_OUT
    pooled = jnp.max(jnp.where(valid, acc3, 0.0), axis=1)           # (B, OC_PAD) f32

    # fc1 + softmax over codes (epilogue kept in f32; exact divide so rows sum to 1).
    logits = jnp.dot(pooled.astype(jnp.bfloat16), wf_ref[...],
                     preferred_element_type=jnp.float32) + bf_ref[...]
    m = jnp.max(logits, axis=-1, keepdims=True)
    e = jnp.exp(logits - m)
    s = jnp.sum(e, axis=-1, keepdims=True)
    out_ref[...] = e / s                                             # one lane-dense store


def icd9_forward(tokens, emb, conv_w, conv_b, fc_w, fc_b):
    # ---- glue: embedding gather + layout plumbing (plain JAX) ----
    # nn.Embedding: (B, E, H) int -> (B, E, H, E) == NCHW input for the conv.
    # dropout1 / dropout2 are identity in eval mode (deterministic kernel).
    # TODO(synk): fuse this gather into the kernel via PrefetchScalarGridSpec
    # (tokens in SMEM + in-kernel row gather) to avoid materializing the embedded
    # activation in HBM; left in XLA at toy size.
    x_nchw = emb[tokens]                                             # (B, C=E, H, W=E)
    x_rows = jnp.transpose(x_nchw, (0, 2, 1, 3)).reshape(BH, CW)     # row b*H+h = x[b,:,h,:]
    x_rows = jnp.pad(x_rows, ((0, BH_PAD - BH), (0, 0)))             # KH-1 extra zero rows
    x_rows = x_rows.astype(jnp.bfloat16)                             # (BH_PAD, CW) bf16

    # Conv2d weight (O, C, KH, W) -> per-tap (KH, C*W, O) matching the row layout.
    wc = jnp.transpose(conv_w, (2, 1, 3, 0)).reshape(KH, CW, OUT_CH)
    wc = jnp.pad(wc, ((0, 0), (0, 0), (0, OC_PAD - OUT_CH))).astype(jnp.bfloat16)
    bc = jnp.pad(conv_b, (0, OC_PAD - OUT_CH)).reshape(1, OC_PAD).astype(jnp.float32)
    wf = jnp.pad(fc_w.T, ((0, OC_PAD - OUT_CH),
                          (0, NC_PAD - NUMCODES))).astype(jnp.bfloat16)
    bf = jnp.concatenate(
        [fc_b.astype(jnp.float32),
         jnp.full((NC_PAD - NUMCODES,), NEG, jnp.float32)]).reshape(1, NC_PAD)

    out_padded = pl.pallas_call(
        _icd9_kernel,
        out_shape=jax.ShapeDtypeStruct((B, NC_PAD), jnp.float32),
        in_specs=[pl.BlockSpec(memory_space=pltpu.MemorySpace.VMEM)] * 5,
        out_specs=pl.BlockSpec(memory_space=pltpu.MemorySpace.VMEM),
    )(x_rows, wc, bc, wf, bf)
    return out_padded[:, :NUMCODES]


def reference_forward(tokens, emb, conv_w, conv_b, fc_w, fc_b):
    """Pure-JAX f32 replica of the PyTorch forward (eval mode) for verification."""
    x = emb[tokens]                                                  # (B, E, H, E) NCHW
    y = lax.conv_general_dilated(x, conv_w, window_strides=(1, 1), padding='VALID',
                                 dimension_numbers=('NCHW', 'OIHW', 'NCHW'))
    y = y + conv_b[None, :, None, None]
    y = jnp.maximum(y, 0.0)
    # TODO(synk): nn.MaxPool2d(2*embed_size) as literally written can never produce a
    # valid output (pool kernel exceeds the conv output extent <= embed_size);
    # implemented as the clearly-intended global max pool so flatten yields the
    # 2*embed_size features fc1 expects.
    y = jnp.max(y, axis=(2, 3))                                      # (B, 2E)
    logits = y @ fc_w.T + fc_b
    return jax.nn.softmax(logits, axis=1)                            # F.softmax default dim=1 for 2D


if __name__ == "__main__":
    key = jax.random.PRNGKey(0)
    k = jax.random.split(key, 6)
    emb = (jax.random.normal(k[0], (VOCAB, EMBED)) * 0.1).astype(jnp.float32)
    conv_w = (jax.random.normal(k[1], (OUT_CH, EMBED, KH, EMBED))
              * (1.0 / jnp.sqrt(EMBED * KH * EMBED))).astype(jnp.float32)
    conv_b = (jax.random.normal(k[2], (OUT_CH,)) * 0.01).astype(jnp.float32)
    fc_w = (jax.random.normal(k[3], (NUMCODES, OUT_CH))
            * (1.0 / jnp.sqrt(OUT_CH))).astype(jnp.float32)
    fc_b = (jax.random.normal(k[4], (NUMCODES,)) * 0.01).astype(jnp.float32)
    tokens = jax.random.randint(k[5], (B, EMBED, H), 0, VOCAB, dtype=jnp.int32)

    out = icd9_forward(tokens, emb, conv_w, conv_b, fc_w, fc_b)
    out = jax.block_until_ready(out)

    ref = reference_forward(tokens, emb, conv_w, conv_b, fc_w, fc_b)
    assert out.shape == (B, NUMCODES)
    # Exact f32 divide in the kernel -> rows sum to 1 up to f32 rounding.
    assert jnp.allclose(jnp.sum(out, axis=-1), 1.0, atol=1e-4)
    # bf16 matmul inputs (f32 accumulation) vs the pure-f32 reference.
    assert jnp.allclose(out, ref, atol=1e-2, rtol=1e-2)
    print("KERNEL_OK")
</pallas_src>

<mosaic_0001>
module attributes {stable_mosaic.version = 11 : i64} {
  func.func @_icd9_kernel(%arg0: memref<40x64xbf16, #tpu.memory_space<vmem>>, %arg1: memref<5x64x128xbf16, #tpu.memory_space<vmem>>, %arg2: memref<1x128xf32, #tpu.memory_space<vmem>>, %arg3: memref<128x128xbf16, #tpu.memory_space<vmem>>, %arg4: memref<1x128xf32, #tpu.memory_space<vmem>>, %arg5: memref<2x128xf32, #tpu.memory_space<vmem>>) attributes {dimension_semantics = [], scalar_prefetch = 0 : i64, scratch_operands = 0 : i64, tpu.core_type = #tpu.core_type<tc>} {
    %c0 = arith.constant 0 : index
    %c0_0 = arith.constant 0 : index
    %0 = vector.load %arg0[%c0, %c0_0] : memref<40x64xbf16, #tpu.memory_space<vmem>>, vector<40x64xbf16>
    %1 = vector.extract_strided_slice %0 {offsets = [0, 0], sizes = [32, 64], strides = [1, 1]} : vector<40x64xbf16> to vector<32x64xbf16>
    %c0_1 = arith.constant 0 : index
    %c0_2 = arith.constant 0 : index
    %c0_3 = arith.constant 0 : index
    %2 = vector.load %arg1[%c0_1, %c0_2, %c0_3] : memref<5x64x128xbf16, #tpu.memory_space<vmem>>, vector<1x64x128xbf16>
    %3 = vector.shape_cast %2 : vector<1x64x128xbf16> to vector<64x128xbf16>
    %cst = arith.constant dense<0.000000e+00> : vector<32x128xf32>
    %4 = tpu.matmul %1, %3, %cst {dimension_numbers = #tpu.dot_dimension_numbers<[1], [0], [0], [1], [0, 0, 1, 1], [], []>} : vector<32x64xbf16>, vector<64x128xbf16>, vector<32x128xf32> -> vector<32x128xf32>
    %5 = vector.extract_strided_slice %0 {offsets = [1, 0], sizes = [32, 64], strides = [1, 1]} : vector<40x64xbf16> to vector<32x64xbf16>
    %c1 = arith.constant 1 : index
    %c0_4 = arith.constant 0 : index
    %c0_5 = arith.constant 0 : index
    %6 = vector.load %arg1[%c1, %c0_4, %c0_5] : memref<5x64x128xbf16, #tpu.memory_space<vmem>>, vector<1x64x128xbf16>
    %7 = vector.shape_cast %6 : vector<1x64x128xbf16> to vector<64x128xbf16>
    %cst_6 = arith.constant dense<0.000000e+00> : vector<32x128xf32>
    %8 = tpu.matmul %5, %7, %cst_6 {dimension_numbers = #tpu.dot_dimension_numbers<[1], [0], [0], [1], [0, 0, 1, 1], [], []>} : vector<32x64xbf16>, vector<64x128xbf16>, vector<32x128xf32> -> vector<32x128xf32>
    %9 = arith.addf %4, %8 : vector<32x128xf32>
    %10 = vector.extract_strided_slice %0 {offsets = [2, 0], sizes = [32, 64], strides = [1, 1]} : vector<40x64xbf16> to vector<32x64xbf16>
    %c2 = arith.constant 2 : index
    %c0_7 = arith.constant 0 : index
    %c0_8 = arith.constant 0 : index
    %11 = vector.load %arg1[%c2, %c0_7, %c0_8] : memref<5x64x128xbf16, #tpu.memory_space<vmem>>, vector<1x64x128xbf16>
    %12 = vector.shape_cast %11 : vector<1x64x128xbf16> to vector<64x128xbf16>
    %cst_9 = arith.constant dense<0.000000e+00> : vector<32x128xf32>
    %13 = tpu.matmul %10, %12, %cst_9 {dimension_numbers = #tpu.dot_dimension_numbers<[1], [0], [0], [1], [0, 0, 1, 1], [], []>} : vector<32x64xbf16>, vector<64x128xbf16>, vector<32x128xf32> -> vector<32x128xf32>
    %14 = arith.addf %9, %13 : vector<32x128xf32>
    %15 = vector.extract_strided_slice %0 {offsets = [3, 0], sizes = [32, 64], strides = [1, 1]} : vector<40x64xbf16> to vector<32x64xbf16>
    %c3 = arith.constant 3 : index
    %c0_10 = arith.constant 0 : index
    %c0_11 = arith.constant 0 : index
    %16 = vector.load %arg1[%c3, %c0_10, %c0_11] : memref<5x64x128xbf16, #tpu.memory_space<vmem>>, vector<1x64x128xbf16>
    %17 = vector.shape_cast %16 : vector<1x64x128xbf16> to vector<64x128xbf16>
    %cst_12 = arith.constant dense<0.000000e+00> : vector<32x128xf32>
    %18 = tpu.matmul %15, %17, %cst_12 {dimension_numbers = #tpu.dot_dimension_numbers<[1], [0], [0], [1], [0, 0, 1, 1], [], []>} : vector<32x64xbf16>, vector<64x128xbf16>, vector<32x128xf32> -> vector<32x128xf32>
    %19 = arith.addf %14, %18 : vector<32x128xf32>
    %20 = vector.extract_strided_slice %0 {offsets = [4, 0], sizes = [32, 64], strides = [1, 1]} : vector<40x64xbf16> to vector<32x64xbf16>
    %c4 = arith.constant 4 : index
    %c0_13 = arith.constant 0 : index
    %c0_14 = arith.constant 0 : index
    %21 = vector.load %arg1[%c4, %c0_13, %c0_14] : memref<5x64x128xbf16, #tpu.memory_space<vmem>>, vector<1x64x128xbf16>
    %22 = vector.shape_cast %21 : vector<1x64x128xbf16> to vector<64x128xbf16>
    %cst_15 = arith.constant dense<0.000000e+00> : vector<32x128xf32>
    %23 = tpu.matmul %20, %22, %cst_15 {dimension_numbers = #tpu.dot_dimension_numbers<[1], [0], [0], [1], [0, 0, 1, 1], [], []>} : vector<32x64xbf16>, vector<64x128xbf16>, vector<32x128xf32> -> vector<32x128xf32>
    %24 = arith.addf %19, %23 : vector<32x128xf32>
    %c0_16 = arith.constant 0 : index
    %c0_17 = arith.constant 0 : index
    %25 = vector.load %arg2[%c0_16, %c0_17] : memref<1x128xf32, #tpu.memory_space<vmem>>, vector<1x128xf32>
    %26 = vector.broadcast %25 : vector<1x128xf32> to vector<32x128xf32>
    %27 = arith.addf %24, %26 : vector<32x128xf32>
    %cst_18 = arith.constant 0.000000e+00 : f32
    %28 = vector.broadcast %cst_18 : f32 to vector<32x128xf32>
    %29 = arith.maximumf %27, %28 : vector<32x128xf32>
    %30 = vector.shape_cast %29 : vector<32x128xf32> to vector<2x16x128xf32>
    %31 = tpu.iota {dimensions = array<i32: 1>} : vector<2x16x128xi32>
    %c12_i32 = arith.constant 12 : i32
    %32 = vector.broadcast %c12_i32 : i32 to vector<2x16x128xi32>
    %33 = arith.cmpi slt, %31, %32 : vector<2x16x128xi32>
    %cst_19 = arith.constant 0.000000e+00 : f32
    %34 = vector.broadcast %cst_19 : f32 to vector<2x16x128xf32>
    %35 = arith.select %33, %30, %34 : vector<2x16x128xi1>, vector<2x16x128xf32>
    %cst_20 = arith.constant dense<0xFF800000> : vector<2x128xf32>
    %36 = vector.multi_reduction <maximumf>, %35, %cst_20 [1] : vector<2x16x128xf32> to vector<2x128xf32>
    %37 = arith.truncf %36 : vector<2x128xf32> to vector<2x128xbf16>
    %c0_21 = arith.constant 0 : index
    %c0_22 = arith.constant 0 : index
    %38 = vector.load %arg3[%c0_21, %c0_22] : memref<128x128xbf16, #tpu.memory_space<vmem>>, vector<128x128xbf16>
    %cst_23 = arith.constant dense<0.000000e+00> : vector<2x128xf32>
    %39 = tpu.matmul %37, %38, %cst_23 {dimension_numbers = #tpu.dot_dimension_numbers<[1], [0], [0], [1], [0, 0, 1, 1], [], []>} : vector<2x128xbf16>, vector<128x128xbf16>, vector<2x128xf32> -> vector<2x128xf32>
    %c0_24 = arith.constant 0 : index
    %c0_25 = arith.constant 0 : index
    %40 = vector.load %arg4[%c0_24, %c0_25] : memref<1x128xf32, #tpu.memory_space<vmem>>, vector<1x128xf32>
    %41 = vector.broadcast %40 : vector<1x128xf32> to vector<2x128xf32>
    %42 = arith.addf %39, %41 : vector<2x128xf32>
    %cst_26 = arith.constant dense<0xFF800000> : vector<2xf32>
    %43 = vector.multi_reduction <maximumf>, %42, %cst_26 [1] : vector<2x128xf32> to vector<2xf32>
    %44 = vector.shape_cast %43 : vector<2xf32> to vector<2x1xf32>
    %45 = vector.broadcast %44 : vector<2x1xf32> to vector<2x128xf32>
    %46 = arith.subf %42, %45 : vector<2x128xf32>
    %47 = math.exp %46 : vector<2x128xf32>
    %cst_27 = arith.constant dense<0.000000e+00> : vector<2xf32>
    %48 = vector.multi_reduction <add>, %47, %cst_27 [1] : vector<2x128xf32> to vector<2xf32>
    %49 = vector.shape_cast %48 : vector<2xf32> to vector<2x1xf32>
    %50 = vector.broadcast %49 : vector<2x1xf32> to vector<2x128xf32>
    %51 = arith.divf %47, %50 : vector<2x128xf32>
    %c0_28 = arith.constant 0 : index
    %c0_29 = arith.constant 0 : index
    %52 = vector.load %arg5[%c0_28, %c0_29] : memref<2x128xf32, #tpu.memory_space<vmem>>, vector<2x128xf32>
    tpu.vector_store %arg5[%c0_28, %c0_29], %51 {strides = array<i32>} : memref<2x128xf32, #tpu.memory_space<vmem>>, vector<2x128xf32>,
    return
  }
}

</mosaic_0001>

<bundles_post_ra>
// kernel: tpu_custom_call.1
= control target key start
LH: loop header
LB: loop body
LE: loop exit
PB: predicated region body
PF: predicated region fallthrough
CT: control target
= control target key end

     0   :  { %10 = vsyncpa [#allocation3], 0  ;;  %s970_s0 = inlined_call_operand.hbm [shape: bf16[40,64], index: 0, kind: input, shape index: {}]   ;;  %s971_s1 = inlined_call_operand.hbm [shape: bf16[5,64,128], index: 1, kind: input, shape index: {}]   ;;  %s972_s2 = inlined_call_operand.vmem [shape: f32[1,128], index: 2, kind: input, shape index: {}]   ;;  %s973_s3 = inlined_call_operand.hbm [shape: bf16[128,128], index: 3, kind: input, shape index: {}]   ;;  %s974_s4 = inlined_call_operand.vmem [shape: f32[1,128], index: 4, kind: input, shape index: {}]   ;;  %s975_s5 = inlined_call_operand.hbm [shape: f32[2,128], index: 5, kind: output, shape index: {}]  }
   0x1   :  { %11 = vsyncpa [#allocation6], 0 }
   0x2   :  { %12 = vsyncpa [#allocation4], 0  ;;  %s30_s20 = sshll.u32 %s971_s1, 4  ;;  %s882_s21 = smov [#allocation5]   ;;  %s31_s20 = int_to_ptr.hbm [resolvable:$true] %s30_s20 }
   0x3   :  { %s32_s22 = sshll.u32 %s882_s21, 4  ;;  %s17_s25 = sshll.u32 %s970_s0, 4  ;;  %s33_s22 = int_to_ptr.vmem [resolvable:$true] %s32_s22  ;;  %s18_s25 = int_to_ptr.hbm [resolvable:$true] %s17_s25 }
   0x4   :  { %s883_s26 = smov 64   ;;  %s884_s27 = smov 4  }
   0x5   :  { %38 = dma.hbm_to_vmem [thread:$0]  %s31_s20, 2560, %s33_s22, [#allocation6], %s883_s26, %s883_s26, %s884_s27  }
   0x6   :  { %s885_s28 = smov [#allocation2]   ;;  %s45_s7 = sshll.u32 %s973_s3, 4  ;;  %s46_s7 = int_to_ptr.hbm [resolvable:$true] %s45_s7 }
   0x7   :  { %s19_s29 = sshll.u32 %s885_s28, 4  ;;  %s886_s1 = smov [#allocation7]   ;;  %s20_s29 = int_to_ptr.vmem [resolvable:$true] %s19_s29 }
   0x8   :  { %25 = dma.hbm_to_vmem [thread:$0]  %s18_s25, 320, %s20_s29, [#allocation3], %s883_s26, %s883_s26, %s884_s27  }
   0x9   :  { %s47_s8 = sshll.u32 %s886_s1, 4  ;;  %s48_s8 = int_to_ptr.vmem [resolvable:$true] %s47_s8 }
   0xa   :  { %53 = dma.hbm_to_vmem [thread:$0]  %s46_s7, 1024, %s48_s8, [#allocation6], %s883_s26, %s883_s26, %s884_s27  }
   0xb   :  { %876 = dma.done.wait [#allocation3], 320  }
   0xc   :  { %877 = vsyncadd [#allocation3], 4294966976 }
   0xd   :  { %878 = dma.done.wait [#allocation6], 3584  }
   0xe   :  { %879 = vsyncadd [#allocation6], 4294963712  ;;  %v743_v0 = vld [vmem:[#allocation5 + $0x38] sm:$0xff]  ;;  %v742_v2 = vld [vmem:[#allocation5 + $0x30] sm:$0xff]  ;;  %vm104_vm0 = vsmask.f32 7424 }
   0xf   :  { %v739_v1 = vld [vmem:[#allocation5 + $0x18] sm:$0xff]  ;;  %764 = vmatpush.bf16.msra.mxu2 %v743_v0  ;;  %v738_v3 = vld [vmem:[#allocation5 + $0x10] sm:$0xff]  ;;  %160 = vmatpush.bf16.msra.mxu0 %v743_v0  ;;  %v741_v12 = vld [vmem:[#allocation5 + $0x28] sm:$0xff]  ;;  %vm299_vm1 = vsmask.f32 6400  ;;  %vm149_vm2 = vcmask 523264  }
  0x10   :  { %207 = vmatpush.bf16.msra.mxu1 %v739_v1  ;;  %v751_v4 = vld [vmem:[#allocation5 + $0x78] sm:$0xff]  ;;  %v750_v7 = vld [vmem:[#allocation5 + $0x70] sm:$0xff]  ;;  %v737_v13 = vld [vmem:[#allocation5 + $0x8] sm:$0xff]  ;;  %vm231_vm3 = vcmask 1046528   ;;  %vm375_vm4 = vcmask 1045504   ;;  %vm495_vm6 = vcmask 1041409  }
  0x11   :  { %v927_v5 = vld [vmem:[#allocation2 + $0x8] sm:$0xff]  ;;  %v73_v6 = vld [vmem:[#allocation2 + $0x10] sm:$0xf]  ;;  %347 = vmatpush.bf16.msra.mxu3 %v751_v4  ;;  %v929_v9 = vld [vmem:[#allocation2] sm:$0xff]  ;;  %vm560_vm7 = vcmask 1041408   ;;  %s593_s13 = sshll.u32 %s975_s5, 4  ;;  %s594_s13 = int_to_ptr.hbm [resolvable:$true] %s593_s13 }
  0x12   :  { %v100_v8 = vunpack.c.l.b16 %v73_v6  ;;  %v113_v10 = vshll.u32 %v927_v5, 16  ;;  %v117_v11 = vshrl.u32 %v927_v5, 16  ;;  %v106_v15 = vshrl.u32 %v929_v9, 16  ;;  %v749_v18 = vld [vmem:[#allocation5 + $0x68] sm:$0xff]  ;;  %v740_v25 = vld [vmem:[#allocation5 + $0x20] sm:$0xff]  ;;  %v747_v29 = vld [vmem:[#allocation5 + $0x58] sm:$0xff] }
  0x13   :  { %765 = vmatpush.bf16.msra.mxu2 %v742_v2  ;;  %v108_v16 = vshll.u32 %v929_v9, 16  ;;  %161 = vmatpush.bf16.msra.mxu0 %v742_v2  ;;  %v736_v26 = vld [vmem:[#allocation5] sm:$0xff]  ;;  %v755_v31 = vld [vmem:[#allocation5 + $0x98] sm:$0xff]  ;;  %v746_v37 = vld [vmem:[#allocation5 + $0x50] sm:$0xff]  ;;  %v232_v47 = vrot.slane %v929_v9, 1  ;;  %v233_v48 = vrot.slane %v927_v5, 1 }
  0x14   :  { %208 = vmatpush.bf16.msra.mxu1 %v738_v3  ;;  %v933_v14 = vpack.c.b16 %v100_v8, %v100_v8  ;;  %v115_v17 = vrot.slane %v113_v10, 1  ;;  %v303_v19 = vrot.slane %v117_v11, 1  ;;  %v304_v20 = vrot.slane %v113_v10, 2  ;;  %v748_v32 = vld [vmem:[#allocation5 + $0x60] sm:$0xff]  ;;  %v754_v38 = vld [vmem:[#allocation5 + $0x90] sm:$0xff]  ;;  %v745_v40 = vld [vmem:[#allocation5 + $0x48] sm:$0xff] }
  0x15   :  { %348 = vmatpush.bf16.msra.mxu3 %v750_v7  ;;  %v110_v22 = vrot.slane %v108_v16, 1  ;;  %v300_v23 = vrot.slane %v106_v15, 1  ;;  %v301_v24 = vrot.slane %v108_v16, 2  ;;  %v753_v41 = vld [vmem:[#allocation5 + $0x88] sm:$0xff]  ;;  %v744_v43 = vld [vmem:[#allocation5 + $0x40] sm:$0xff]  ;;  %v376_v49 = vrot.slane %v929_v9, 2 }
  0x16   :  { %v121_v21 = vshll.u32 %v933_v14, 16  ;;  %v119_v27 = vor.u32 %v117_v11, %v115_v17  ;;  %v305_v34 = vor.u32 %v304_v20, %v303_v19  ;;  %v307_v42 = vshrl.u32 %v933_v14, 16  ;;  %v752_v44 = vld [vmem:[#allocation5 + $0x80] sm:$0xff]  ;;  %v763_v0 = vld [vmem:[#allocation7 + $0x38] sm:$0xff]  ;;  %v762_v2 = vld [vmem:[#allocation7 + $0x30] sm:$0xff] }
  0x17   :  { %766 = vmatpush.bf16.msra.mxu2 %v741_v12  ;;  %162 = vmatpush.bf16.msra.mxu0 %v741_v12  ;;  %v111_v30 = vor.u32 %v110_v22, %v106_v15  ;;  %v302_v33 = vor.u32 %v301_v24, %v300_v23  ;;  %v377_v50 = vrot.slane %v927_v5, 2  ;;  %v234_v52 = vsel %vm231_vm3, %v232_v47, %v233_v48  ;;  %v761_v7 = vld [vmem:[#allocation7 + $0x28] sm:$0xff]  ;;  %v760_v10 = vld [vmem:[#allocation7 + $0x20] sm:$0xff]  ;;  %v758_v22 = vld [vmem:[#allocation7 + $0x10] sm:$0xff] }
  0x18   :  { %209 = vmatpush.bf16.msra.mxu1 %v737_v13  ;;  %v123_v28 = vrot.slane %v121_v21, 1  ;;  %v309_v45 = vrot.slane %v307_v42, 1  ;;  %v310_v46 = vrot.slane %v121_v21, 2  ;;  %v235_v55 = vrot.slane %v933_v14, 1  ;;  %v774_v21 = vld [vmem:[%s972_s2] ss:$0 sm:$0xff] }
  0x19   :  { %349 = vmatpush.bf16.msra.mxu3 %v749_v18  ;;  %v116_v36 = vsel %vm104_vm0, %v111_v30, %v115_v17  ;;  %v306_v39 = vsel %vm299_vm1, %v302_v33, %v305_v34  ;;  %v378_v53 = vsel %vm375_vm4, %v376_v49, %v377_v50  ;;  %v379_v56 = vrot.slane %v933_v14, 2  ;;  %v759_v17 = vld [vmem:[#allocation7 + $0x18] sm:$0xff] }
  0x1a   :  { %v124_v35 = vsel %vm104_vm0, %v119_v27, %v123_v28  ;;  %v311_v51 = vor.u32 %v310_v46, %v309_v45  ;;  %v236_v57 = vsel %vm231_vm3, %v233_v48, %v235_v55  ;;  %v757_v27 = vld [vmem:[#allocation7 + $0x8] sm:$0xff] }
  0x1b   :  { %767 = vmatpush.bf16.msra.mxu2 %v740_v25  ;;  %163 = vmatpush.bf16.msra.mxu0 %v740_v25  ;;  %v380_v58 = vsel %vm375_vm4, %v377_v50, %v379_v56 }
  0x1c   :  { %210 = vmatpush.bf16.msra.mxu1 %v736_v26  ;;  %v312_v54 = vsel %vm299_vm1, %v305_v34, %v311_v51 }
  0x1d   :  { %350 = vmatpush.bf16.msra.mxu3 %v748_v32 }
  0x1e   :  { %629 = vmatmul.msk.bf16.vlgmr.msra.gmra.mxu2 %vm149_vm2, %v124_v35  ;;  %628 = vmatmul.msk.bf16.vlgmr.msra.gmra.mxu0 %vm149_vm2, %v116_v36  ;;  %v756_v36 = vld [vmem:[#allocation7] sm:$0xff] }
  0x1f   :  { %271 = vmatpush.bf16.msrb.mxu2 %v747_v29  ;;  %415 = vmatpush.bf16.msrb.mxu0 %v755_v31 }
  0x20   :  { %646 = vmatmul.msk.bf16.vlgmr.msra.gmra.mxu1 %vm149_vm2, %v929_v9  ;;  %682 = vmatmul.msk.bf16.vlgmr.msra.gmra.mxu3 %vm149_vm2, %v306_v39  ;;  %v446_v9 = vlaneseq }
  0x21   :  { %547 = vmatpush.bf16.msrb.mxu1 %v763_v0 }
  0x22   :  { %v447_v16 = vshrl.u32 %v446_v9, 7  ;;  %v775_v9 = vld [vmem:[%s974_s4] ss:$0 sm:$0xff]  ;;  %s887_s4 = smov [#allocation8]  }
  0x23   :  { %272 = vmatpush.bf16.msrb.mxu2 %v746_v37  ;;  %416 = vmatpush.bf16.msrb.mxu0 %v754_v38  ;;  %s591_s10 = sshll.u32 %s887_s4, 4  ;;  %s592_s10 = int_to_ptr.vmem [resolvable:$true] %s591_s10 }
  0x24   :  { %v448_v24 = vadd.s32 8, %v447_v16 }
  0x25   :  { %548 = vmatpush.bf16.msrb.mxu1 %v762_v2 }
  0x26   :  { %vm450_vm5 = vcmp.lt.s32.totalorder %v448_v24, 12 }
  0x27   :  { %273 = vmatpush.bf16.msrb.mxu2 %v745_v40  ;;  %417 = vmatpush.bf16.msrb.mxu0 %v753_v41 }
  0x29   :  { %549 = vmatpush.bf16.msrb.mxu1 %v761_v7 }
  0x2b   :  { %274 = vmatpush.bf16.msrb.mxu2 %v744_v43  ;;  %418 = vmatpush.bf16.msrb.mxu0 %v752_v44 }
  0x2d   :  { %550 = vmatpush.bf16.msrb.mxu1 %v760_v10 }
  0x2e   :  { %664 = vmatmul.msk.bf16.vlgmr.msrb.gmra.mxu2 %vm149_vm2, %v234_v52  ;;  %700 = vmatmul.msk.bf16.vlgmr.msrb.gmra.mxu0 %vm149_vm2, %v378_v53 }
  0x30   :  { %647 = vmatmul.msk.bf16.gmra.mxu1 %vm149_vm2, %v927_v5  ;;  %683 = vmatmul.msk.bf16.gmra.mxu3 %vm149_vm2, %v312_v54 }
  0x31   :  { %551 = vmatpush.bf16.msrb.mxu1 %v759_v17 }
  0x35   :  { %552 = vmatpush.bf16.msrb.mxu1 %v758_v22 }
  0x39   :  { %553 = vmatpush.bf16.msrb.mxu1 %v757_v27 }
  0x3d   :  { %554 = vmatpush.bf16.msrb.mxu1 %v756_v36 }
  0x3e   :  { %665 = vmatmul.msk.bf16.gmra.mxu2 %vm149_vm2, %v236_v57  ;;  %701 = vmatmul.msk.bf16.gmra.mxu0 %vm149_vm2, %v380_v58 }
  0x9b   :  { %v165_v59 = vpop.f32.mrf.mxu0 }
  0x9d   :  { %v212_v62 = vpop.f32.mrf.mxu1 }
  0x9e   :  { %v213_v4 = vadd.f32 %v212_v62, %v165_v59 }
  0xa1   :  { %v170_v60 = vpop.f32.mrf.mxu2 }
  0xa3   :  { %v167_v61 = vpop.f32.mrf.mxu0  ;;  %v352_v1 = vpop.f32.mrf.mxu3 }
  0xa5   :  { %v214_v5 = vpop.f32.mrf.mxu1 }
  0xa6   :  { %v215_v13 = vadd.f32 %v214_v5, %v167_v61 }
  0xa9   :  { %v172_v63 = vpop.f32.mrf.mxu2 }
  0xab   :  { %v420_v3 = vpop.f32.mrf.mxu0  ;;  %v354_v12 = vpop.f32.mrf.mxu3 }
  0xad   :  { %v217_v19 = vpop.f32.mrf.mxu1 }
  0xae   :  { %v218_v29 = vadd.f32 %v217_v19, %v170_v60 }
  0xb1   :  { %v276_v6 = vpop.f32.mrf.mxu2 }
  0xb2   :  { %v286_v8 = vadd.f32 %v276_v6, %v213_v4 }
  0xb3   :  { %v422_v14 = vpop.f32.mrf.mxu0  ;;  %v357_v30 = vpop.f32.mrf.mxu3 }
  0xb4   :  { %v362_v11 = vadd.f32 %v352_v1, %v286_v8 }
  0xb5   :  { %v219_v38 = vpop.f32.mrf.mxu1 }
  0xb6   :  { %v430_v20 = vadd.f32 %v420_v3, %v362_v11  ;;  %v220_v41 = vadd.f32 %v219_v38, %v172_v63 }
  0xb8   :  { %v438_v26 = vadd.f32 %v774_v21, %v430_v20 }
  0xb9   :  { %v278_v15 = vpop.f32.mrf.mxu2 }
  0xba   :  { %v287_v18 = vadd.f32 %v278_v15, %v215_v13  ;;  %v442_v33 = vmax.f32 %v438_v26, 0.0 }
  0xbb   :  { %v425_v34 = vpop.f32.mrf.mxu0  ;;  %v359_v46 = vpop.f32.mrf.mxu3 }
  0xbc   :  { %v363_v23 = vadd.f32 %v354_v12, %v287_v18 }
  0xbe   :  { %v431_v25 = vadd.f32 %v422_v14, %v363_v23 }
  0xc0   :  { %v439_v28 = vadd.f32 %v774_v21, %v431_v25 }
  0xc1   :  { %v281_v31 = vpop.f32.mrf.mxu2 }
  0xc2   :  { %v443_v32 = vmax.f32 %v439_v28, 0.0  ;;  %v288_v35 = vadd.f32 %v281_v31, %v218_v29 }
  0xc3   :  { %v427_v49 = vpop.f32.mrf.mxu0 }
  0xc4   :  { %v452_v37 = vsel %vm450_vm5, %v443_v32, 0.0  ;;  %v364_v40 = vadd.f32 %v357_v30, %v288_v35 }
  0xc5   :  { %v455_v39 = vmax.f32 %v442_v33, %v452_v37 }
  0xc6   :  { %v432_v45 = vadd.f32 %v425_v34, %v364_v40 }
  0xc7   :  { %v456_v42 = vrot.slane %v455_v39, 4 }
  0xc8   :  { %v440_v51 = vadd.f32 %v774_v21, %v432_v45 }
  0xc9   :  { %v283_v43 = vpop.f32.mrf.mxu2  ;;  %v457_v48 = vmax.f32 %v455_v39, %v456_v42 }
  0xca   :  { %v289_v44 = vadd.f32 %v283_v43, %v220_v41  ;;  %v444_v55 = vmax.f32 %v440_v51, 0.0 }
  0xcb   :  { %v458_v53 = vrot.slane %v457_v48, 2 }
  0xcc   :  { %v365_v47 = vadd.f32 %v359_v46, %v289_v44 }
  0xcd   :  { %v459_v58 = vmax.f32 %v457_v48, %v458_v53 }
  0xce   :  { %v433_v50 = vadd.f32 %v427_v49, %v365_v47 }
  0xcf   :  { %v460_v61 = vrot.slane %v459_v58, 1 }
  0xd0   :  { %v441_v52 = vadd.f32 %v774_v21, %v433_v50 }
  0xd1   :  { %v461_v63 = vmax.f32 %v459_v58, %v460_v61 }
  0xd2   :  { %v445_v54 = vmax.f32 %v441_v52, 0.0 }
  0xd3   :  { %v469_v3 = vpack.c.bf16 %v461_v63, %v461_v63 }
  0xd4   :  { %v454_v56 = vsel %vm450_vm5, %v445_v54, 0.0 }
  0xd5   :  { %v462_v57 = vmax.f32 %v444_v55, %v454_v56  ;;  %v493_v5 = vunpack.c.l.b16 %v469_v3 }
  0xd7   :  { %v463_v59 = vrot.slane %v462_v57, 4 }
  0xd9   :  { %v464_v60 = vmax.f32 %v462_v57, %v463_v59 }
  0xdb   :  { %v465_v62 = vrot.slane %v464_v60, 2 }
  0xdd   :  { %v466_v0 = vmax.f32 %v464_v60, %v465_v62 }
  0xdf   :  { %v467_v1 = vrot.slane %v466_v0, 1 }
  0xe1   :  { %v468_v2 = vmax.f32 %v466_v0, %v467_v1 }
  0xe3   :  { %v470_v4 = vpack.c.bf16 %v468_v2, %v468_v2 }
  0xe5   :  { %v494_v6 = vunpack.c.l.b16 %v470_v4 }
  0xe7   :  { %v496_v7 = vsel %vm495_vm6, %v494_v6, %v493_v5 }
  0xe8   :  { %v497_v8 = vpack.c.b16 %v496_v7, %v496_v7 }
  0xea   :  { %555 = vmatmul.bf16.vlgmr.msrb.gmra.mxu1 %v497_v8 }
 0x167   :  { %v556_v10 = vpop.f32.mrf.mxu1 }
 0x168   :  { %v557_v11 = vadd.f32 %v775_v9, %v556_v10 }
 0x16a   :  { %v561_v12 = vsel %vm560_vm7, %v557_v11, -inf }
 0x16b   :  { %562 = vmax.xlane.f32.xlu0 %v561_v12 }
 0x16f   :  { %v558_v13 = vpop.f32.mrf.mxu1 }
 0x1de   :  { %v563_v14 = vpop.xlane.xlu0 %562 }
 0x1df   :  { %v564_v15 = vsub.f32 %v557_v11, %v563_v14 }
 0x1e1   :  { %v565_v16 = vmul.f32 1.442695, %v564_v15 }
 0x1e3   :  { %776 = vpow2.f32 %v565_v16 }
 0x1e9   :  { %v777_v17 = vpop.eup %776 }
 0x1ea   :  { %v567_v18 = vsel %vm560_vm7, %v777_v17, 0.0 }
 0x1eb   :  { %568 = vadd.xlane.f32.xlu0 %v567_v18 }
 0x25e   :  { %v569_v19 = vpop.xlane.xlu0 %568 }
 0x25f   :  { %778 = vrcp.f32 %v569_v19  ;;  %v581_v23 = vand.u32 2147483648, %v569_v19  ;;  %v579_v25 = vand.u32 2147483647, %v569_v19  ;;  %vm575_vm9 = vweird.f32 %v569_v19 }
 0x261   :  { %v582_v27 = vor.u32 1.1754944e-38, %v581_v23  ;;  %vm580_vm11 = vcmp.eq.f32.partialorder %v579_v25, 8.507059e+37 }
 0x265   :  { %v779_v20 = vpop.eup %778 }
 0x266   :  { %v571_v21 = vmul.f32 %v779_v20, %v569_v19  ;;  %vm576_vm8 = vweird.f32 %v779_v20 }
 0x267   :  { %vm577_vm10 = vmor %vm575_vm9, %vm576_vm8 }
 0x268   :  { %v572_v22 = vsub.f32 1.0, %v571_v21 }
 0x26a   :  { %v573_v24 = vmul.f32 %v779_v20, %v572_v22 }
 0x26c   :  { %v574_v26 = vadd.f32 %v779_v20, %v573_v24 }
 0x26e   :  { %v578_v28 = vsel %vm577_vm10, %v779_v20, %v574_v26 }
 0x26f   :  { %v583_v29 = vsel %vm580_vm11, %v582_v27, %v578_v28 }
 0x270   :  { %v584_v30 = vmul.f32 %v777_v17, %v583_v29 }
 0x272   :  { %585 = vst [vmem:[#allocation8] sm:$0x3] %v584_v30 }
 0x273   :  { %596 = dma.vmem_to_hbm [thread:$0]  %s592_s10, 32, %s594_s13, [#allocation4]  }
 0x274   :  { %880 = dma.done.wait [#allocation4], 32  }
 0x275   :  { %881 = vsyncadd [#allocation4], 4294967264 }
 0x276   :  { %601 = vsyncpa [#allocation3], 1 }
 0x277   :  { %602 = vsyncpa [#allocation6], 1 }
 0x278   :  { %603 = vsyncpa [#allocation4], 1 }

</bundles_post_ra>
